<compile_context>
chip_gen: v7x
topology: tpu7x:2x2x1
jax: 0.10.0
libtpu: 0.0.40
codegen_flags: <defaults>
</compile_context>

<pallas_src>
import functools

import jax
import jax.numpy as jnp
from jax import lax
from jax.experimental import pallas as pl
from jax.experimental.pallas import tpu as pltpu


# ---------------------------------------------------------------------------
# Kernels
# ---------------------------------------------------------------------------

def _segment_embedding(seg_col_ref, seg_table_ref):
    """Vectorized 3-way select from the VMEM-resident (3, D) segment table."""
    seg_tab = seg_table_ref[...]                   # (3, D)
    seg_col = seg_col_ref[...]                     # (TILE_S, 1) int32
    return jnp.where(
        seg_col == 0, seg_tab[0:1, :],
        jnp.where(seg_col == 1, seg_tab[1:2, :], seg_tab[2:3, :]))   # (TILE_S, D)


def _embed_kernel_hbm(tok_ids_ref,          # SMEM (B*S,) int32   -- scalar prefetch
                      seg_col_ref,          # VMEM (TILE_S, 1) int32
                      seg_table_ref,        # VMEM (3, D) f32     -- resident
                      pos_ref,              # VMEM (TILE_S, D) f32 -- reused across batch
                      tok_hbm_ref,          # HBM  (vocab, D) f32 -- memory_space=pl.ANY
                      out_ref,              # VMEM (TILE_S, D) f32
                      dma_sems,             # DMA semaphores (NBUF,)
                      *, seq_len, tile_s, nbuf, unroll):
    st = pl.program_id(0)
    b = pl.program_id(1)
    base = b * seq_len + st * tile_s

    def start_row(r, row):
        pltpu.make_async_copy(
            tok_hbm_ref.at[pl.ds(row, 1)],
            out_ref.at[pl.ds(r, 1)],
            dma_sems.at[r % nbuf],
        ).start()

    # Prime the DMA ring: keep `nbuf` row gathers in flight (statically unrolled).
    for r in range(nbuf):
        start_row(r, tok_ids_ref[base + r])

    # Drain + refill: wait row r, immediately issue row r + nbuf.
    def drain_body(r, carry):
        # Hoist scalar (SMEM) reads above the wait: .wait() breaks sst->sld forwarding.
        cur_row = tok_ids_ref[base + r]
        nxt_row = tok_ids_ref[base + jnp.minimum(r + nbuf, tile_s - 1)]

        # Rebuild the exact (src, dst, sem) descriptor used by start_row for the wait.
        pltpu.make_async_copy(
            tok_hbm_ref.at[pl.ds(cur_row, 1)],
            out_ref.at[pl.ds(r, 1)],
            dma_sems.at[r % nbuf],
        ).wait()

        @pl.when(r + nbuf < tile_s)
        def _():
            start_row(r + nbuf, nxt_row)

        return carry

    lax.fori_loop(0, tile_s, drain_body, 0, unroll=unroll)

    # out_ref now holds the gathered token embeddings; add segment + positional in place.
    out_ref[...] = out_ref[...] + _segment_embedding(seg_col_ref, seg_table_ref) + pos_ref[...]


def _embed_kernel_vmem(tok_ids_ref,         # SMEM (B*S,) int32   -- scalar prefetch
                       seg_col_ref,         # VMEM (TILE_S, 1) int32
                       seg_table_ref,       # VMEM (3, D) f32     -- resident
                       pos_ref,             # VMEM (TILE_S, D) f32 -- reused across batch
                       tok_vmem_ref,        # VMEM (vocab, D) f32 -- fully resident
                       out_ref,             # VMEM (TILE_S, D) f32
                       *, seq_len, tile_s, unroll):
    st = pl.program_id(0)
    b = pl.program_id(1)
    base = b * seq_len + st * tile_s

    # In-VMEM row gather: pure vector loads/stores, no HBM descriptors.
    def gather_body(r, carry):
        row = tok_ids_ref[base + r]
        out_ref[pl.ds(r, 1), :] = tok_vmem_ref[pl.ds(row, 1), :]
        return carry

    lax.fori_loop(0, tile_s, gather_body, 0, unroll=unroll)

    out_ref[...] = out_ref[...] + _segment_embedding(seg_col_ref, seg_table_ref) + pos_ref[...]


# ---------------------------------------------------------------------------
# Wrapper
# ---------------------------------------------------------------------------

def _pick_tile_s(seq_len, max_tile=512):
    """Largest tile <= max_tile that divides seq_len (multiple of 8 when tiling)."""
    if seq_len <= max_tile:
        return seq_len
    for t in range(max_tile - (max_tile % 8), 7, -8):
        if seq_len % t == 0:
            return t
    return seq_len   # fallback: whole sequence as one tile (block == full dim, always legal)


def _tpu_vmem_capacity_bytes(default=64 << 20):
    try:
        info = pltpu.get_tpu_info()
        cap = getattr(info, "vmem_capacity_bytes", None)
        return int(cap) if cap else default
    except Exception:
        return default


def bert_embedding_pallas(token_ids, segment_label, token_table, segment_table, pos_table,
                          *, max_tile=512, token_table_in_vmem=None):
    """token_ids, segment_label: (B, S) int32.  Tables: (vocab, D), (3, D), (S, D) float32."""
    B, S = token_ids.shape
    vocab, D = token_table.shape
    # Original module broadcasts the full positional table; requires S == max_seq_length.
    assert pos_table.shape[0] == S, "pos_table rows must equal the input sequence length"
    assert segment_table.shape == (3, D)

    tile_s = _pick_tile_s(S, max_tile)
    assert S % tile_s == 0
    nbuf = min(16, tile_s)        # outstanding gather DMAs (HBM path)
    unroll = min(8, tile_s)       # inner-loop unroll factor

    itemsize = jnp.dtype(token_table.dtype).itemsize
    tile_bytes = tile_s * D * itemsize
    table_bytes = vocab * D * itemsize
    # Double-buffered pos + out tiles, seg-id column (lane padded), resident seg table.
    pipeline_bytes = 4 * tile_bytes + 2 * tile_s * 128 * 4 + 3 * D * itemsize

    capacity = _tpu_vmem_capacity_bytes()
    if token_table_in_vmem is None:
        # Keep the token table VMEM-resident only where it fits comfortably (v5e/v6e style);
        # on v7x-sized VMEM with a real BERT vocab this falls back to the HBM DMA-ring gather.
        token_table_in_vmem = (table_bytes + pipeline_bytes) <= (capacity * 3) // 4

    vmem_need = pipeline_bytes + (table_bytes if token_table_in_vmem else 0)
    vmem_limit = int(min(capacity, max(32 << 20, vmem_need + (16 << 20))))

    tok_ids_flat = token_ids.reshape(-1).astype(jnp.int32)          # 1-D SMEM, no 2-D padding
    seg_col = segment_label.astype(jnp.int32)[..., None]            # (B, S, 1) column layout

    # Grid: sequence tiles outer, batch inner -> pos tile block index constant across the inner
    # axis, so its DMA is skipped for every batch element after the first.
    grid = (S // tile_s, B)

    in_specs = [
        # segment ids as a (TILE_S, 1) column per tile
        pl.BlockSpec((None, tile_s, 1), lambda st, b, tok: (b, st, 0)),
        # segment table fully VMEM-resident (constant index -> fetched once)
        pl.BlockSpec((3, D), lambda st, b, tok: (0, 0)),
        # dense positional tile, reused across the batch axis
        pl.BlockSpec((tile_s, D), lambda st, b, tok: (st, 0)),
    ]

    if token_table_in_vmem:
        in_specs.append(pl.BlockSpec((vocab, D), lambda st, b, tok: (0, 0)))
        kernel = functools.partial(_embed_kernel_vmem, seq_len=S, tile_s=tile_s, unroll=unroll)
        scratch_shapes = []
    else:
        in_specs.append(pl.BlockSpec(memory_space=pl.ANY))
        kernel = functools.partial(_embed_kernel_hbm, seq_len=S, tile_s=tile_s,
                                   nbuf=nbuf, unroll=unroll)
        scratch_shapes = [pltpu.SemaphoreType.DMA((nbuf,))]

    grid_spec = pltpu.PrefetchScalarGridSpec(
        num_scalar_prefetch=1,
        grid=grid,
        in_specs=in_specs,
        out_specs=pl.BlockSpec((None, tile_s, D), lambda st, b, tok: (b, st, 0)),
        scratch_shapes=scratch_shapes,
    )

    return pl.pallas_call(
        kernel,
        out_shape=jax.ShapeDtypeStruct((B, S, D), token_table.dtype),
        grid_spec=grid_spec,
        compiler_params=pltpu.CompilerParams(
            dimension_semantics=("parallel", "parallel"),
            vmem_limit_bytes=vmem_limit),
    )(tok_ids_flat, seg_col, segment_table, pos_table, token_table)


def make_positional_encoding_table(seq_len, dmodel):
    """Same construction as PositionalEncoding.__init__ (sin on even cols, cos on odd cols)."""
    position_ids = jnp.arange(0, seq_len, dtype=jnp.float32)[:, None]          # (S, 1)
    frequencies = jnp.power(
        10000.0, -jnp.arange(0, dmodel, 2, dtype=jnp.float32) / dmodel)        # (D/2,)
    angles = position_ids * frequencies                                        # (S, D/2)
    table = jnp.zeros((seq_len, dmodel), dtype=jnp.float32)
    table = table.at[:, 0::2].set(jnp.sin(angles))
    table = table.at[:, 1::2].set(jnp.cos(angles))
    return table


if __name__ == "__main__":
    # Small, deterministic setup consistent with the module.
    vocab_size = 32
    embed_size = 32   # dmodel
    seq_len = 8       # max_seq_length == actual seq length (required for the broadcast add)
    batch = 2

    key = jax.random.PRNGKey(0)
    k_tok, k_seg, k_ids, k_segids = jax.random.split(key, 4)

    # nn.Embedding(vocab_size, embed_size, padding_idx=0): row 0 zeroed.
    token_table = jax.random.normal(k_tok, (vocab_size, embed_size), dtype=jnp.float32)
    token_table = token_table.at[0].set(0.0)
    # nn.Embedding(3, embed_size, padding_idx=0): row 0 zeroed.
    segment_table = jax.random.normal(k_seg, (3, embed_size), dtype=jnp.float32)
    segment_table = segment_table.at[0].set(0.0)
    pos_table = make_positional_encoding_table(seq_len, embed_size)

    token_ids = jax.random.randint(k_ids, (batch, seq_len), 0, vocab_size, dtype=jnp.int32)
    segment_label = jax.random.randint(k_segids, (batch, seq_len), 0, 3, dtype=jnp.int32)

    # Pure-JAX reference (dropout in eval mode = identity).
    ref = (token_table[token_ids] + segment_table[segment_label]
           + pos_table[None, :, :])

    # Exercise both table-placement paths: VMEM-resident gather and HBM DMA-ring gather.
    out_vmem = jax.block_until_ready(
        bert_embedding_pallas(token_ids, segment_label, token_table, segment_table,
                              pos_table, token_table_in_vmem=True))
    out_hbm = jax.block_until_ready(
        bert_embedding_pallas(token_ids, segment_label, token_table, segment_table,
                              pos_table, token_table_in_vmem=False))

    assert out_vmem.shape == (batch, seq_len, embed_size)
    assert out_hbm.shape == (batch, seq_len, embed_size)
    assert jnp.allclose(out_vmem, ref, atol=1e-5, rtol=1e-5)
    assert jnp.allclose(out_hbm, ref, atol=1e-5, rtol=1e-5)

    print("KERNEL_OK")
</pallas_src>

<mosaic_0001>
module attributes {stable_mosaic.version = 11 : i64} {
  func.func @_embed_kernel_vmem(%arg0: i32, %arg1: i32, %arg2: memref<16xi32, #tpu.memory_space<smem>>, %arg3: memref<1x8x1xi32, #tpu.memory_space<vmem>>, %arg4: memref<3x32xf32, #tpu.memory_space<vmem>>, %arg5: memref<8x32xf32, #tpu.memory_space<vmem>>, %arg6: memref<32x32xf32, #tpu.memory_space<vmem>>, %arg7: memref<1x8x32xf32, #tpu.memory_space<vmem>>) attributes {dimension_semantics = [#tpu.dimension_semantics<parallel>, #tpu.dimension_semantics<parallel>], iteration_bounds = array<i64: 1, 2>, scalar_prefetch = 1 : i64, scratch_operands = 0 : i64, tpu.core_type = #tpu.core_type<tc>, window_params = [{transform_indices = @transform_0, window_bounds = array<i64: 1, 8, 1>}, {pipeline_mode = #tpu.pipeline_mode<synchronous>, transform_indices = @transform_1, window_bounds = array<i64: 3, 32>}, {transform_indices = @transform_2, window_bounds = array<i64: 8, 32>}, {pipeline_mode = #tpu.pipeline_mode<synchronous>, transform_indices = @transform_3, window_bounds = array<i64: 32, 32>}, {transform_indices = @transform_4, window_bounds = array<i64: 1, 8, 32>}]} {
    %c8_i32 = arith.constant 8 : i32
    %0 = arith.muli %arg1, %c8_i32 : i32
    %c8_i32_0 = arith.constant 8 : i32
    %1 = arith.muli %arg0, %c8_i32_0 : i32
    %2 = arith.addi %0, %1 : i32
    %c0_i32 = arith.constant 0 : i32
    %3 = arith.addi %2, %c0_i32 : i32
    %4 = arith.index_cast %3 : i32 to index
    %5 = memref.load %arg2[%4] : memref<16xi32, #tpu.memory_space<smem>>
    %6 = arith.index_cast %5 : i32 to index
    %c0 = arith.constant 0 : index
    %7 = vector.load %arg6[%6, %c0] : memref<32x32xf32, #tpu.memory_space<vmem>>, vector<1x32xf32>
    %c0_1 = arith.constant 0 : index
    %8 = arith.index_cast %c0_i32 : i32 to index
    %c0_2 = arith.constant 0 : index
    %9 = vector.load %arg7[%c0_1, %8, %c0_2] : memref<1x8x32xf32, #tpu.memory_space<vmem>>, vector<1x1x32xf32>
    %10 = vector.shape_cast %9 : vector<1x1x32xf32> to vector<1x32xf32>
    %11 = vector.shape_cast %7 : vector<1x32xf32> to vector<1x1x32xf32>
    tpu.vector_store %arg7[%c0_1, %8, %c0_2], %11 {strides = array<i32>} : memref<1x8x32xf32, #tpu.memory_space<vmem>>, vector<1x1x32xf32>,
    %c1_i32 = arith.constant 1 : i32
    %12 = arith.addi %2, %c1_i32 : i32
    %13 = arith.index_cast %12 : i32 to index
    %14 = memref.load %arg2[%13] : memref<16xi32, #tpu.memory_space<smem>>
    %15 = arith.index_cast %14 : i32 to index
    %c0_3 = arith.constant 0 : index
    %16 = vector.load %arg6[%15, %c0_3] : memref<32x32xf32, #tpu.memory_space<vmem>>, vector<1x32xf32>
    %c0_4 = arith.constant 0 : index
    %17 = arith.index_cast %c1_i32 : i32 to index
    %c0_5 = arith.constant 0 : index
    %18 = vector.load %arg7[%c0_4, %17, %c0_5] : memref<1x8x32xf32, #tpu.memory_space<vmem>>, vector<1x1x32xf32>
    %19 = vector.shape_cast %18 : vector<1x1x32xf32> to vector<1x32xf32>
    %20 = vector.shape_cast %16 : vector<1x32xf32> to vector<1x1x32xf32>
    tpu.vector_store %arg7[%c0_4, %17, %c0_5], %20 {strides = array<i32>} : memref<1x8x32xf32, #tpu.memory_space<vmem>>, vector<1x1x32xf32>,
    %c2_i32 = arith.constant 2 : i32
    %21 = arith.addi %2, %c2_i32 : i32
    %22 = arith.index_cast %21 : i32 to index
    %23 = memref.load %arg2[%22] : memref<16xi32, #tpu.memory_space<smem>>
    %24 = arith.index_cast %23 : i32 to index
    %c0_6 = arith.constant 0 : index
    %25 = vector.load %arg6[%24, %c0_6] : memref<32x32xf32, #tpu.memory_space<vmem>>, vector<1x32xf32>
    %c0_7 = arith.constant 0 : index
    %26 = arith.index_cast %c2_i32 : i32 to index
    %c0_8 = arith.constant 0 : index
    %27 = vector.load %arg7[%c0_7, %26, %c0_8] : memref<1x8x32xf32, #tpu.memory_space<vmem>>, vector<1x1x32xf32>
    %28 = vector.shape_cast %27 : vector<1x1x32xf32> to vector<1x32xf32>
    %29 = vector.shape_cast %25 : vector<1x32xf32> to vector<1x1x32xf32>
    tpu.vector_store %arg7[%c0_7, %26, %c0_8], %29 {strides = array<i32>} : memref<1x8x32xf32, #tpu.memory_space<vmem>>, vector<1x1x32xf32>,
    %c3_i32 = arith.constant 3 : i32
    %30 = arith.addi %2, %c3_i32 : i32
    %31 = arith.index_cast %30 : i32 to index
    %32 = memref.load %arg2[%31] : memref<16xi32, #tpu.memory_space<smem>>
    %33 = arith.index_cast %32 : i32 to index
    %c0_9 = arith.constant 0 : index
    %34 = vector.load %arg6[%33, %c0_9] : memref<32x32xf32, #tpu.memory_space<vmem>>, vector<1x32xf32>
    %c0_10 = arith.constant 0 : index
    %35 = arith.index_cast %c3_i32 : i32 to index
    %c0_11 = arith.constant 0 : index
    %36 = vector.load %arg7[%c0_10, %35, %c0_11] : memref<1x8x32xf32, #tpu.memory_space<vmem>>, vector<1x1x32xf32>
    %37 = vector.shape_cast %36 : vector<1x1x32xf32> to vector<1x32xf32>
    %38 = vector.shape_cast %34 : vector<1x32xf32> to vector<1x1x32xf32>
    tpu.vector_store %arg7[%c0_10, %35, %c0_11], %38 {strides = array<i32>} : memref<1x8x32xf32, #tpu.memory_space<vmem>>, vector<1x1x32xf32>,
    %c4_i32 = arith.constant 4 : i32
    %39 = arith.addi %2, %c4_i32 : i32
    %40 = arith.index_cast %39 : i32 to index
    %41 = memref.load %arg2[%40] : memref<16xi32, #tpu.memory_space<smem>>
    %42 = arith.index_cast %41 : i32 to index
    %c0_12 = arith.constant 0 : index
    %43 = vector.load %arg6[%42, %c0_12] : memref<32x32xf32, #tpu.memory_space<vmem>>, vector<1x32xf32>
    %c0_13 = arith.constant 0 : index
    %44 = arith.index_cast %c4_i32 : i32 to index
    %c0_14 = arith.constant 0 : index
    %45 = vector.load %arg7[%c0_13, %44, %c0_14] : memref<1x8x32xf32, #tpu.memory_space<vmem>>, vector<1x1x32xf32>
    %46 = vector.shape_cast %45 : vector<1x1x32xf32> to vector<1x32xf32>
    %47 = vector.shape_cast %43 : vector<1x32xf32> to vector<1x1x32xf32>
    tpu.vector_store %arg7[%c0_13, %44, %c0_14], %47 {strides = array<i32>} : memref<1x8x32xf32, #tpu.memory_space<vmem>>, vector<1x1x32xf32>,
    %c5_i32 = arith.constant 5 : i32
    %48 = arith.addi %2, %c5_i32 : i32
    %49 = arith.index_cast %48 : i32 to index
    %50 = memref.load %arg2[%49] : memref<16xi32, #tpu.memory_space<smem>>
    %51 = arith.index_cast %50 : i32 to index
    %c0_15 = arith.constant 0 : index
    %52 = vector.load %arg6[%51, %c0_15] : memref<32x32xf32, #tpu.memory_space<vmem>>, vector<1x32xf32>
    %c0_16 = arith.constant 0 : index
    %53 = arith.index_cast %c5_i32 : i32 to index
    %c0_17 = arith.constant 0 : index
    %54 = vector.load %arg7[%c0_16, %53, %c0_17] : memref<1x8x32xf32, #tpu.memory_space<vmem>>, vector<1x1x32xf32>
    %55 = vector.shape_cast %54 : vector<1x1x32xf32> to vector<1x32xf32>
    %56 = vector.shape_cast %52 : vector<1x32xf32> to vector<1x1x32xf32>
    tpu.vector_store %arg7[%c0_16, %53, %c0_17], %56 {strides = array<i32>} : memref<1x8x32xf32, #tpu.memory_space<vmem>>, vector<1x1x32xf32>,
    %c6_i32 = arith.constant 6 : i32
    %57 = arith.addi %2, %c6_i32 : i32
    %58 = arith.index_cast %57 : i32 to index
    %59 = memref.load %arg2[%58] : memref<16xi32, #tpu.memory_space<smem>>
    %60 = arith.index_cast %59 : i32 to index
    %c0_18 = arith.constant 0 : index
    %61 = vector.load %arg6[%60, %c0_18] : memref<32x32xf32, #tpu.memory_space<vmem>>, vector<1x32xf32>
    %c0_19 = arith.constant 0 : index
    %62 = arith.index_cast %c6_i32 : i32 to index
    %c0_20 = arith.constant 0 : index
    %63 = vector.load %arg7[%c0_19, %62, %c0_20] : memref<1x8x32xf32, #tpu.memory_space<vmem>>, vector<1x1x32xf32>
    %64 = vector.shape_cast %63 : vector<1x1x32xf32> to vector<1x32xf32>
    %65 = vector.shape_cast %61 : vector<1x32xf32> to vector<1x1x32xf32>
    tpu.vector_store %arg7[%c0_19, %62, %c0_20], %65 {strides = array<i32>} : memref<1x8x32xf32, #tpu.memory_space<vmem>>, vector<1x1x32xf32>,
    %c7_i32 = arith.constant 7 : i32
    %66 = arith.addi %2, %c7_i32 : i32
    %67 = arith.index_cast %66 : i32 to index
    %68 = memref.load %arg2[%67] : memref<16xi32, #tpu.memory_space<smem>>
    %69 = arith.index_cast %68 : i32 to index
    %c0_21 = arith.constant 0 : index
    %70 = vector.load %arg6[%69, %c0_21] : memref<32x32xf32, #tpu.memory_space<vmem>>, vector<1x32xf32>
    %c0_22 = arith.constant 0 : index
    %71 = arith.index_cast %c7_i32 : i32 to index
    %c0_23 = arith.constant 0 : index
    %72 = vector.load %arg7[%c0_22, %71, %c0_23] : memref<1x8x32xf32, #tpu.memory_space<vmem>>, vector<1x1x32xf32>
    %73 = vector.shape_cast %72 : vector<1x1x32xf32> to vector<1x32xf32>
    %74 = vector.shape_cast %70 : vector<1x32xf32> to vector<1x1x32xf32>
    tpu.vector_store %arg7[%c0_22, %71, %c0_23], %74 {strides = array<i32>} : memref<1x8x32xf32, #tpu.memory_space<vmem>>, vector<1x1x32xf32>,
    %c8_i32_24 = arith.constant 8 : i32
    %c0_25 = arith.constant 0 : index
    %c0_26 = arith.constant 0 : index
    %c0_27 = arith.constant 0 : index
    %75 = vector.load %arg7[%c0_25, %c0_26, %c0_27] : memref<1x8x32xf32, #tpu.memory_space<vmem>>, vector<1x8x32xf32>
    %76 = vector.shape_cast %75 : vector<1x8x32xf32> to vector<8x32xf32>
    %c0_28 = arith.constant 0 : index
    %c0_29 = arith.constant 0 : index
    %77 = vector.load %arg4[%c0_28, %c0_29] : memref<3x32xf32, #tpu.memory_space<vmem>>, vector<3x32xf32>
    %c0_30 = arith.constant 0 : index
    %c0_31 = arith.constant 0 : index
    %c0_32 = arith.constant 0 : index
    %78 = vector.load %arg3[%c0_30, %c0_31, %c0_32] : memref<1x8x1xi32, #tpu.memory_space<vmem>>, vector<1x8x1xi32>
    %79 = vector.shape_cast %78 : vector<1x8x1xi32> to vector<8x1xi32>
    %c0_i32_33 = arith.constant 0 : i32
    %80 = vector.broadcast %c0_i32_33 : i32 to vector<8x1xi32>
    %81 = arith.cmpi eq, %79, %80 : vector<8x1xi32>
    %82 = vector.extract_strided_slice %77 {offsets = [0, 0], sizes = [1, 32], strides = [1, 1]} : vector<3x32xf32> to vector<1x32xf32>
    %c1_i32_34 = arith.constant 1 : i32
    %83 = vector.broadcast %c1_i32_34 : i32 to vector<8x1xi32>
    %84 = arith.cmpi eq, %79, %83 : vector<8x1xi32>
    %85 = vector.extract_strided_slice %77 {offsets = [1, 0], sizes = [1, 32], strides = [1, 1]} : vector<3x32xf32> to vector<1x32xf32>
    %86 = vector.extract_strided_slice %77 {offsets = [2, 0], sizes = [1, 32], strides = [1, 1]} : vector<3x32xf32> to vector<1x32xf32>
    %87 = vector.shape_cast %84 : vector<8x1xi1> to vector<8x1xi1>
    %88 = vector.broadcast %87 : vector<8x1xi1> to vector<8x32xi1>
    %89 = vector.shape_cast %85 : vector<1x32xf32> to vector<1x32xf32>
    %90 = vector.broadcast %89 : vector<1x32xf32> to vector<8x32xf32>
    %91 = vector.shape_cast %86 : vector<1x32xf32> to vector<1x32xf32>
    %92 = vector.broadcast %91 : vector<1x32xf32> to vector<8x32xf32>
    %93 = arith.select %88, %90, %92 : vector<8x32xi1>, vector<8x32xf32>
    %94 = vector.shape_cast %81 : vector<8x1xi1> to vector<8x1xi1>
    %95 = vector.broadcast %94 : vector<8x1xi1> to vector<8x32xi1>
    %96 = vector.shape_cast %82 : vector<1x32xf32> to vector<1x32xf32>
    %97 = vector.broadcast %96 : vector<1x32xf32> to vector<8x32xf32>
    %98 = arith.select %95, %97, %93 : vector<8x32xi1>, vector<8x32xf32>
    %99 = arith.addf %76, %98 : vector<8x32xf32>
    %c0_35 = arith.constant 0 : index
    %c0_36 = arith.constant 0 : index
    %100 = vector.load %arg5[%c0_35, %c0_36] : memref<8x32xf32, #tpu.memory_space<vmem>>, vector<8x32xf32>
    %101 = arith.addf %99, %100 : vector<8x32xf32>
    %c0_37 = arith.constant 0 : index
    %c0_38 = arith.constant 0 : index
    %c0_39 = arith.constant 0 : index
    %102 = vector.load %arg7[%c0_37, %c0_38, %c0_39] : memref<1x8x32xf32, #tpu.memory_space<vmem>>, vector<1x8x32xf32>
    %103 = vector.shape_cast %102 : vector<1x8x32xf32> to vector<8x32xf32>
    %104 = vector.shape_cast %101 : vector<8x32xf32> to vector<1x8x32xf32>
    tpu.vector_store %arg7[%c0_37, %c0_38, %c0_39], %104 {strides = array<i32>} : memref<1x8x32xf32, #tpu.memory_space<vmem>>, vector<1x8x32xf32>,
    return
  }
  func.func @transform_0(%arg0: i32, %arg1: i32, %arg2: memref<16xi32, #tpu.memory_space<smem>>) -> (i32, i32, i32) {
    %c0_i32 = arith.constant 0 : i32
    %c0_i32_0 = arith.constant 0 : i32
    return %arg1, %arg0, %c0_i32 : i32, i32, i32
  }
  func.func @transform_1(%arg0: i32, %arg1: i32, %arg2: memref<16xi32, #tpu.memory_space<smem>>) -> (i32, i32) {
    %c0_i32 = arith.constant 0 : i32
    %c0_i32_0 = arith.constant 0 : i32
    %c0_i32_1 = arith.constant 0 : i32
    return %c0_i32, %c0_i32_0 : i32, i32
  }
  func.func @transform_2(%arg0: i32, %arg1: i32, %arg2: memref<16xi32, #tpu.memory_space<smem>>) -> (i32, i32) {
    %c0_i32 = arith.constant 0 : i32
    %c0_i32_0 = arith.constant 0 : i32
    return %arg0, %c0_i32 : i32, i32
  }
  func.func @transform_3(%arg0: i32, %arg1: i32, %arg2: memref<16xi32, #tpu.memory_space<smem>>) -> (i32, i32) {
    %c0_i32 = arith.constant 0 : i32
    %c0_i32_0 = arith.constant 0 : i32
    %c0_i32_1 = arith.constant 0 : i32
    return %c0_i32, %c0_i32_0 : i32, i32
  }
  func.func @transform_4(%arg0: i32, %arg1: i32, %arg2: memref<16xi32, #tpu.memory_space<smem>>) -> (i32, i32, i32) {
    %c0_i32 = arith.constant 0 : i32
    %c0_i32_0 = arith.constant 0 : i32
    return %arg1, %arg0, %c0_i32 : i32, i32, i32
  }
}

</mosaic_0001>

<bundles_post_ra>
// kernel: tpu_custom_call.1
= control target key start
LH: loop header
LB: loop body
LE: loop exit
PB: predicated region body
PF: predicated region fallthrough
CT: control target
= control target key end

     0   :  { %s981_s0 = inlined_call_operand.vmem [shape: s32[16], index: 0, kind: input, shape index: {}]   ;;  %s982_s1 = inlined_call_operand.vmem [shape: s32[2,8,1], index: 1, kind: input, shape index: {}]   ;;  %s983_s2 = inlined_call_operand.hbm [shape: f32[3,32], index: 2, kind: input, shape index: {}]   ;;  %s984_s3 = inlined_call_operand.hbm [shape: f32[8,32], index: 3, kind: input, shape index: {}]   ;;  %s985_s4 = inlined_call_operand.vmem [shape: f32[32,32], index: 4, kind: input, shape index: {}]   ;;  %s986_s5 = inlined_call_operand.hbm [shape: f32[2,8,32], index: 5, kind: output, shape index: {}]  }
   0x1   :  { %994 = sst [smem:[#allocation17_spill]] %s982_s1  ;;  %s10_s20 = sshll.u32 %s981_s0, 4  ;;  %s11_s20 = int_to_ptr.vmem [resolvable:$true] %s10_s20 }
   0x2   :  { %995 = sst [smem:[#allocation18_spill]] %s983_s2  ;;  %s548_s21 = scalar_lea.vmem %s11_s20, 16 }
   0x3   :  { %996 = sst [smem:[#allocation19_spill]] %s984_s3  ;;  %p549_p0 = scmp.ne.s32.totalorder %s11_s20, %s548_s21 }
   0x4   :  { %p553_p1 = scmp.lt.s32.totalorder %s11_s20, %s11_s20  ;;  %p554_p2 = scmp.lt.s32.totalorder %s548_s21, %s548_s21 }
   0x6   :  { %p555_p3 = por %p554_p2, %p553_p1 }
   0x8   :  { %p556_p4 = pnand %p555_p3, %p549_p0 }
   0xa   :  { %559 = shalt.err (!%p556_p4)  }
   0xb   :  { %s706_s22 = smov [#allocation3]  }
   0xc   :  { %13 = dma.vmem_to_smem %s11_s20, 16, %s706_s22, [#allocation2] }
   0xd   :  { %668 = dma.done.wait [#allocation2], 16 }
   0xe   :  { %669 = vsyncadd [#allocation2], 4294967280 }
   0xf   :  { %15 = sfence }
  0x10   :  { %16 = vsyncpa [#allocation5], 0 }
  0x11   :  { %17 = vsyncpa [#allocation8], 0 }
  0x12   :  { %18 = vsyncpa [#allocation6], 0 }
  0x13   :  { %20 = vsyncpa [#allocation6 + $0x1], 0  ;;  %s744_s23 = smov 0   ;;  %s746_s0 = smov 0  }
  0x14   :  { %s748_s24 = smov 0   ;;  %s750_s25 = smov 0  }
  0x15   :  { %s752_s26 = smov 0   ;;  %s754_s27 = smov 0  }
  0x16 LB: > { %997 = sst [smem:[#allocation14_spill]] %s700_s26  ;;  %s453_s28 = sadd.s32 4294967295, %s704_s27   ;;  %s704_s27 = sphi %s754_s27, %s26_s27   ;;  %s700_s26 = sphi %s752_s26, %s1015_s26   ;;  %s696_s25 = sphi %s750_s25, %s1014_s25   ;;  %s692_s24 = sphi %s748_s24, %s1018_s24   ;;  %s688_s0 = sphi %s746_s0, %s1017_s0   ;;  %s684_s23 = sphi %s744_s23, %s1016_s23  }
  0x17   : > { %s454_s29 = sadd.s32 4294967294, %s704_s27   ;;  %s35_s30 = sadd.s32 1, %s700_s26 }
  0x18   : > { %s143_s6 = sadd.s32 1, %s692_s24  ;;  %p36_p5 = scmp.ge.s32.totalorder %s35_s30, 2 }
  0x19   : > { %p153_p6 = scmp.ne.s32.totalorder %s692_s24, %s688_s0  ;;  %p154_p7 = scmp.eq.s32.totalorder %s453_s28, 1 }
  0x1a   : > { %p159_p8 = scmp.ne.s32.totalorder %s688_s0, %s684_s23  ;;  %s1020_s30 = smov (%p36_p5, %s35_s30), 0 }
  0x1b   : > { %998 = sst [smem:[#allocation15_spill]] %s1020_s30  ;;  %p784_p9 = por %p154_p7, %p153_p6 }
  0x1c   : > { %p160_p10 = scmp.eq.s32.totalorder %s454_s29, 1  ;;  %s138_s8 = ssub.s32 %s700_s26, %s1020_s30 }
  0x1d   : > { %s999_s7 = scalar_select %p784_p9, 1, 0 }
  0x1e   : > { %p455_p11 = scmp.ge.s32.totalorder %s704_s27, 1  ;;  %p141_p12 = scmp.eq.s32.totalorder %s138_s8, 0 }
  0x1f   : > { %p791_p13 = por %p160_p10, %p159_p8  ;;  %p167_p0 = scmp.lt.s32.totalorder %s704_s27, 3 }
  0x20   : > { %s797_s10 = scalar_select %p141_p12, %s692_s24, %s143_s6  }
  0x21   : > { %s1000_s9 = scalar_select %p791_p13, 1, 0 }
  0x22   : > { %1001 = sst [smem:[#allocation16_spill]] %s797_s10  ;;  %p799_p1 = pnand %p455_p11, %p167_p0 }
  0x23   : > { %p803_p2 = scmp.eq.s32.totalorder %s453_s28, 0  ;;  %s707_s13 = smov [#allocation4]  }
  0x24   : > { %s1002_s11 = scalar_select %p799_p1, 1, 0 }
  0x25   : > { %s1003_s12 = scalar_select %p803_p2, 1, 0 }
  0x26   : > { %p479_p3 = pneg %p799_p1  ;;  %s180_s14 = sshll.u32 %s707_s13, 4  ;;  %s181_s14 = int_to_ptr.vmem [resolvable:$true] %s180_s14 }
  0x27   : > { %s708_s15 = smov [#allocation7]   ;;  %s1005_s2 = sld [smem:[#allocation18_spill]] }
  0x28   : > { %s193_s16 = sshll.u32 %s708_s15, 4  ;;  %p811_p4 = pnand %p803_p2, %p479_p3  ;;  %s815_s16 = int_to_ptr.vmem [resolvable:$true] %s193_s16 }
  0x2a   : > { %p562_p6 = pneg %p811_p4 }
  0x2d   : > { %s560_s20 = scalar_lea.hbm %s1005_s2, 64 }
  0x2e   : > { %p561_p5 = scmp.ne.s32.totalorder %s1005_s2, %s560_s20  ;;  %p567_p10 = scmp.lt.u32.totalorder %s560_s20, %s1005_s2 }
  0x30   : > { %p563_p7 = pnand %p562_p6, %p561_p5 }
  0x32   : > { %p564_p8 = pneg %p563_p7 }
  0x34   : > { %p569_p11 = pnand %p567_p10, %p564_p8 }
  0x36   : > { %572 = shalt.err (!%p569_p11)
}
  0x37   : > { %s573_s6 = scalar_lea.vmem %s181_s14, 64  ;;  %p581_p13 = scmp.lt.s32.totalorder %s181_s14, %s181_s14 }
  0x38   : > { %p574_p12 = scmp.ne.s32.totalorder %s181_s14, %s573_s6  ;;  %p582_p9 = scmp.lt.s32.totalorder %s573_s6, %s573_s6 }
  0x3a   : > { %p576_p0 = pnand %p574_p12, %p562_p6  ;;  %p583_p2 = por %p582_p9, %p581_p13 }
  0x3c   : > { %p577_p3 = pneg %p576_p0 }
  0x3e   : > { %p584_p1 = pnand %p583_p2, %p577_p3 }
  0x40   : > { %587 = shalt.err (!%p584_p1)
}
  0x41   : > { %482 = dma.hbm_to_vmem [thread:$0]  (!%p811_p4), %s1005_s2, 64, %s181_s14, [#allocation5]  }
  0x42   : > { %s1006_s3 = sld [smem:[#allocation19_spill]] }
  0x48   : > { %s588_s19 = scalar_lea.hbm %s1006_s3, 128 }
  0x49   : > { %p589_p5 = scmp.ne.s32.totalorder %s1006_s3, %s588_s19  ;;  %p595_p1 = scmp.lt.u32.totalorder %s588_s19, %s1006_s3 }
  0x4b   : > { %p591_p9 = pnand %p589_p5, %p562_p6 }
  0x4d   : > { %p592_p13 = pneg %p591_p9 }
  0x4f   : > { %p597_p2 = pnand %p595_p1, %p592_p13 }
  0x51   : > { %600 = shalt.err (!%p597_p2)
}
  0x52   : > { %s601_s14 = scalar_lea.vmem %s815_s16, 128  ;;  %p609_p11 = scmp.lt.s32.totalorder %s815_s16, %s815_s16 }
  0x53   : > { %p602_p7 = scmp.ne.s32.totalorder %s815_s16, %s601_s14  ;;  %p610_p12 = scmp.lt.s32.totalorder %s601_s14, %s601_s14 }
  0x55   : > { %p604_p8 = pnand %p602_p7, %p562_p6  ;;  %p611_p0 = por %p610_p12, %p609_p11 }
  0x57   : > { %p605_p10 = pneg %p604_p8 }
  0x59   : > { %p612_p3 = pnand %p611_p0, %p605_p10 }
  0x5b   : > { %615 = shalt.err (!%p612_p3)
}
  0x5c   : > { %485 = dma.hbm_to_vmem [thread:$0]  (!%p811_p4), %s1006_s3, 128, %s815_s16, [#allocation8]  }
  0x5d   : > { %p1007_p5 = scmp.ne.s32.totalorder %s1002_s11, 0 }
  0x5e   : > { %p1008_p9 = scmp.ne.s32.totalorder (!%p1007_p5), %s1003_s12, 0 }
  0x5f   : > { %219 = sbr.rel (%p1007_p5) target bundleno = 271 (0x10f), region = 36 }
  0x66   : > { %671 = dma.done.wait (%p1008_p9), [#allocation5], 64  }
  0x67   : > { %673 = vsyncadd (%p1008_p9), [#allocation5], 4294967232 }
  0x68   : > { %675 = dma.done.wait (%p1008_p9), [#allocation8], 128  }
  0x69   : > { %677 = vsyncadd (%p1008_p9), [#allocation8], 4294967168  ;;  %p251_p4 = scmp.lt.s32.totalorder %s696_s25, 1  ;;  %s464_s11 = sshll.u32 %s696_s25, 3  ;;  %v709_v0 = vmov 0   ;;  %vm264_vm2 = vcmask 253952   ;;  %v311_v12 = vlaneseq }
  0x6a   : > { %547 = vset.pattern.permute.xlu0 %v709_v0  ;;  %s266_s16 = sadd.s32 1, %s464_s11  ;;  %s271_s8 = sadd.s32 2, %s464_s11  ;;  %v302_v16 = vld [vmem:[#allocation4] sm:$0x7]  ;;  %v331_v25 = vld [vmem:[#allocation7] sm:$0xff]  ;;  %vm333_vm5 = vcmask 261120  }
  0x6b   : > { %s252_s17 = scalar_select %p251_p4, %s696_s25, 1  ;;  %v312_v13 = vshrl.u32 %v311_v12, 7 }
  0x6c   : > { %s276_s13 = sadd.s32 3, %s464_s11  ;;  %s281_s18 = sadd.s32 4, %s464_s11 }
  0x6d   : > { %s463_s15 = sshll.u32 %s252_s17, 3  ;;  %s1009_s1 = sld [smem:[#allocation17_spill]]  ;;  %v313_v14 = vsub.s32 1, %v312_v13  ;;  %v317_v15 = vsub.s32 2, %v312_v13  ;;  %v327_v17 = vsub.s32 0, %v312_v13 }
  0x6e   : > { %s993_s21 = sand.u32 1, %s688_s0   ;;  %s286_s28 = sadd.s32 5, %s464_s11 }
  0x6f   : > { %s462_s22 = sshll.u32 %s993_s21, 3  ;;  %s291_s14 = sadd.s32 6, %s464_s11  ;;  %v314_v19 = vrot.slane %v302_v16, %v313_v14  ;;  %v318_v20 = vrot.slane %v302_v16, %v317_v15  ;;  %v328_v21 = vrot.slane %v302_v16, %v327_v17 }
  0x70   : > { %s296_s29 = sadd.s32 7, %s464_s11  ;;  %s261_s6 = sld [smem:[#allocation3 + %s464_s11]] }
  0x71   : > { %s267_s2 = sld [smem:[#allocation3 + %s266_s16]]  ;;  %p1011_p13 = scmp.ne.s32.totalorder %s999_s7, 0 }
  0x72   : > { %s272_s3 = sld [smem:[#allocation3 + %s271_s8]] }
  0x73   : > { %s257_s12 = scalar_lea.vmem %s1009_s1, %s463_s15  ;;  %s277_s30 = sld [smem:[#allocation3 + %s276_s13]] }
  0x74   : > { %v303_v1 = vld [vmem:[%s257_s12] sm:$0xff]  ;;  %s282_s17 = sld [smem:[#allocation3 + %s281_s18]] }
  0x75   : > { %vm305_vm0 = vcmp.eq.s32.totalorder %v303_v1, 1  ;;  %vm304_vm1 = vcmp.eq.s32.totalorder %v303_v1, 0  ;;  %s287_s26 = sld [smem:[#allocation3 + %s286_s28]] }
  0x76   : > { %v306_v2 = vsel %vm305_vm0, 1, %v709_v0  ;;  %v320_v3 = vsel %vm304_vm1, 1, %v709_v0  ;;  %s292_s19 = sld [smem:[#allocation3 + %s291_s14]]  ;;  %s262_s12 = scalar_lea.vmem %s985_s4, %s261_s6 }
  0x77   : > { %308 = vperm.xlu0 %547, %v306_v2   ;;  %s297_s15 = sld [smem:[#allocation3 + %s296_s29]]  ;;  %s268_s11 = scalar_lea.vmem %s985_s4, %s267_s2  ;;  %v263_v4 = vld [vmem:[%s262_s12] sm:$0x1] }
  0x78   : > { %v269_v5 = vld [vmem:[%s268_s11] sm:$0x1]  ;;  %s273_s13 = scalar_lea.vmem %s985_s4, %s272_s3  ;;  %s895_s29 = scalar_lea.vmem [#allocation9], %s462_s22 }
  0x79   : > { %s278_s14 = scalar_lea.vmem %s985_s4, %s277_s30  ;;  %265 = vst.msk [vmem:[%s895_s29] sm:$0x1] %vm264_vm2, %v263_v4  ;;  %270 = vst.msk [vmem:[%s895_s29 + $0x1] sm:$0x1] %vm264_vm2, %v269_v5  ;;  %v274_v6 = vld [vmem:[%s273_s13] sm:$0x1] }
  0x7a   : > { %v279_v7 = vld [vmem:[%s278_s14] sm:$0x1]  ;;  %s283_s3 = scalar_lea.vmem %s985_s4, %s282_s17  ;;  %275 = vst.msk [vmem:[%s895_s29 + $0x2] sm:$0x1] %vm264_vm2, %v274_v6  ;;  %s350_s17 = sshll.u32 %s895_s29, 4  ;;  %s933_s17 = int_to_ptr.vmem [resolvable:$true] %s350_s17 }
  0x7b   : > { %322 = vperm.xlu0 %547, %v320_v3   ;;  %s288_s21 = scalar_lea.vmem %s985_s4, %s287_s26  ;;  %280 = vst.msk [vmem:[%s895_s29 + $0x3] sm:$0x1] %vm264_vm2, %v279_v7  ;;  %v284_v8 = vld [vmem:[%s283_s3] sm:$0x1]  ;;  %s466_s26 = sshll.u32 %s696_s25, 7 }
  0x7c   : > { %v289_v9 = vld [vmem:[%s288_s21] sm:$0x1]  ;;  %s293_s20 = scalar_lea.vmem %s985_s4, %s292_s19  ;;  %285 = vst.msk [vmem:[%s895_s29 + $0x4] sm:$0x1] %vm264_vm2, %v284_v8  ;;  %s931_s8 = scalar_lea.hbm %s986_s5, %s466_s26 }
  0x7d   : > { %s298_s16 = scalar_lea.vmem %s985_s4, %s297_s15  ;;  %290 = vst.msk [vmem:[%s895_s29 + $0x5] sm:$0x1] %vm264_vm2, %v289_v9  ;;  %v294_v10 = vld [vmem:[%s293_s20] sm:$0x1]  ;;  %s1010_s13 = sand.u32 1, %s688_s0  }
  0x7e   : > { %v299_v11 = vld [vmem:[%s298_s16] sm:$0x1]  ;;  %295 = vst.msk [vmem:[%s895_s29 + $0x6] sm:$0x1] %vm264_vm2, %v294_v10  ;;  %s336_s18 = scalar_lea.sflag [#allocation6], %s1010_s13  ;;  %s616_s28 = scalar_lea.vmem %s933_s17, 128 }
  0x7f   : > { %300 = vst.msk [vmem:[%s895_s29 + $0x7] sm:$0x1] %vm264_vm2, %v299_v11  ;;  %p617_p6 = scmp.ne.s32.totalorder %s933_s17, %s616_s28  ;;  %s710_s25 = smov [#allocation9]  }
  0x80   : > { %s620_s14 = sshll.u32 %s710_s25, 4  ;;  %s621_s14 = int_to_ptr.vmem [resolvable:$false] %s620_s14 }
  0x81   : > { %p618_p1 = pnand %p617_p6, %p1011_p13  ;;  %s622_s1 = scalar_lea.vmem %s621_s14, 256 }
  0x82   : > { %p623_p7 = scmp.lt.s32.totalorder %s933_s17, %s621_s14  ;;  %p624_p8 = scmp.lt.s32.totalorder %s622_s1, %s616_s28 }
  0x83   : > { %p619_p2 = pneg %p618_p1 }
  0x84   : > { %p625_p10 = por %p624_p8, %p623_p7 }
  0x86   : > { %v301_v23 = vld [vmem:[%s895_s29] sm:$0xff]  ;;  %p626_p11 = pnand %p625_p10, %p619_p2 }
  0xf6   : > { %v309_v18 = vpop.permute.xlu0 %308 }
  0xf7   : > { %vm310_vm3 = vcmp.eq.s32.totalorder %v309_v18, 1 }
  0xf8   : > { %v319_v24 = vsel %vm310_vm3, %v314_v19, %v318_v20 }
  0xfa   : > { %v323_v22 = vpop.permute.xlu0 %322 }
  0xfb   : > { %vm324_vm4 = vcmp.eq.s32.totalorder %v323_v22, 1 }
  0xfc   : > { %v329_v26 = vsel %vm324_vm4, %v328_v21, %v319_v24 }
  0xfd   : > { %v330_v27 = vadd.f32 %v329_v26, %v301_v23 }
  0xff   : > { %v332_v28 = vadd.f32 %v331_v25, %v330_v27 }
 0x101   : > { %334 = vst.msk [vmem:[%s895_s29] sm:$0xff] %vm333_vm5, %v332_v28 }
 0x102   : > { %629 = shalt.err (!%p626_p11)
}
 0x103   : > { %s630_s29 = scalar_lea.hbm %s931_s8, 128  ;;  %s634_s30 = scalar_lea.hbm %s986_s5, 256 }
 0x104   : > { %p631_p12 = scmp.ne.s32.totalorder %s931_s8, %s630_s29  ;;  %p635_p5 = scmp.lt.u32.totalorder %s931_s8, %s986_s5 }
 0x105   : > { %p636_p9 = scmp.lt.u32.totalorder %s634_s30, %s630_s29  ;;  %p638_p6 = scmp.lt.u32.totalorder %s630_s29, %s931_s8 }
 0x106   : > { %p632_p0 = pnand %p631_p12, %p1011_p13 }
 0x107   : > { %p637_p4 = por %p636_p9, %p635_p5 }
 0x108   : > { %p633_p3 = pneg %p632_p0 }
 0x109   : > { %p639_p1 = por %p638_p6, %p637_p4 }
 0x10b   : > { %p640_p2 = pnand %p639_p1, %p633_p3 }
 0x10d   : > { %643 = shalt.err (!%p640_p2)
}
 0x10e   : > { %477 = dma.vmem_to_hbm [thread:$0]  (%p1011_p13), %s933_s17, 128, %s931_s8, %s336_s18  }
 0x10f PF: > { %p494_p7 = scmp.ge.s32.totalorder %s704_s27, 2  ;;  %s362_s22 = sand.u32 1, %s684_s23  }
 0x110   : > { %p1012_p8 = scmp.ne.s32.totalorder %s1000_s9, 0  ;;  %s363_s6 = scalar_lea.sflag [#allocation6], %s362_s22 }
 0x112   : > { %p487_p10 = pnand %p494_p7, %p1012_p8 }
 0x114   : > { %679 = dma.done.wait (!%p487_p10), %s363_s6, 128  }
 0x115   : > { %681 = vsyncadd (!%p487_p10), %s363_s6, 4294967168  ;;  %s26_s27 = sadd.s32 1, %s704_s27   ;;  %s1013_s7 = sld [smem:[#allocation16_spill]] }
 0x116   : > { %p23_p11 = scmp.ge.s32.totalorder %s26_s27, 4   ;;  %s1014_s25 = sld [smem:[#allocation14_spill]] }
 0x117   : > { %s1015_s26 = sld [smem:[#allocation15_spill]]  ;;  %s1016_s23 = smov %s688_s0 }
 0x118   : > { %s1017_s0 = smov %s692_s24  ;;  %25 = sbr.rel (!%p23_p11) target bundleno = 22 (0x16), region = 89 }
 0x11b   : > { %s1018_s24 = smov %s1013_s7 }
 0x11f   :  { %368 = vsyncpa [#allocation5], 1 }
 0x120   :  { %370 = vsyncpa [#allocation5 + $0x1], 1 }
 0x121   :  { %371 = vsyncpa [#allocation8], 1 }
 0x122   :  { %372 = vsyncpa [#allocation6], 1 }
 0x123   :  { %374 = vsyncpa [#allocation6 + $0x1], 1 }

</bundles_post_ra>
